<compile_context>
chip_gen: v5e
topology: v5e:2x2
jax: 0.10.0
libtpu: 0.0.40
codegen_flags: <defaults>
</compile_context>

<pallas_src>
import functools

import jax
import jax.numpy as jnp
from jax.experimental import pallas as pl
from jax.experimental.pallas import tpu as pltpu


def _round_up(a, m):
    return (a + m - 1) // m * m


def _ffn_kernel(x_ref, w1_ref, b1_ref, w2_ref, b2_ref, o_ref, acc_ref):
    # Grid: (row tiles [parallel], hidden chunks [arbitrary / reduction]).
    k = pl.program_id(1)

    @pl.when(k == 0)
    def _init():
        acc_ref[...] = jnp.zeros_like(acc_ref)

    # ---- first linear (one hidden chunk): x @ W1[:, k-chunk] + b1[k-chunk]  (MXU) ----
    # Native-dtype operands, f32 accumulation.
    h = jnp.dot(x_ref[...], w1_ref[...], preferred_element_type=jnp.float32)
    h = h + b1_ref[...].astype(jnp.float32)

    # ---- exact GELU (erf form, PyTorch default) in f32 (VPU + EUP) ----
    h = 0.5 * h * (1.0 + jax.lax.erf(h * 0.7071067811865476))

    # ---- dropout ----
    # TODO(synk): training-mode dropout (mask via pltpu.prng_random_bits); eval mode == identity.

    # ---- second linear, partial sum over hidden: acc += gelu(h) @ W2[k-chunk, :]  (MXU) ----
    acc_ref[...] += jnp.dot(h.astype(x_ref.dtype), w2_ref[...],
                            preferred_element_type=jnp.float32)

    # ---- finalize: add b2 exactly once, downcast, store lane-dense output tile ----
    @pl.when(k == pl.num_programs(1) - 1)
    def _finalize():
        o_ref[...] = (acc_ref[...] + b2_ref[...].astype(jnp.float32)).astype(o_ref.dtype)


@functools.partial(jax.jit, static_argnames=("tile_m", "tile_h"))
def feed_forward(x, w1, b1, w2, b2, *, tile_m=256, tile_h=512):
    """x: [N, d_model]; w1: [d_model, hidden]; w2: [hidden, d_model]. Returns [N, d_model]."""
    n, d_model = x.shape
    hidden = w1.shape[1]
    assert w1.shape == (d_model, hidden)
    assert w2.shape == (hidden, d_model)
    assert tile_m % 8 == 0 and tile_h % 128 == 0

    # Lane-dense (multiple-of-128) feature dims; sublane-aligned (multiple-of-8) row tiles.
    d_model_p = _round_up(d_model, 128)
    tm = min(tile_m, _round_up(n, 8))
    n_p = _round_up(n, tm)
    th = min(tile_h, _round_up(hidden, 128))
    hidden_p = _round_up(hidden, th)

    def pad2(a, r, c):
        return jnp.pad(a, ((0, r - a.shape[0]), (0, c - a.shape[1])))

    # Zero padding is exact: padded x columns hit zero W1 rows, padded hidden columns have
    # zero bias (GELU(0)=0) and zero W2 rows, padded output columns are sliced off below.
    x_p = pad2(x, n_p, d_model_p)
    w1_p = pad2(w1, d_model_p, hidden_p)
    w2_p = pad2(w2, hidden_p, d_model_p)
    b1_p = pad2(b1.reshape(1, hidden), 1, hidden_p)
    b2_p = pad2(b2.reshape(1, d_model), 1, d_model_p)

    grid = (n_p // tm, hidden_p // th)

    itemsize = x.dtype.itemsize
    resident = (2 * tm * d_model_p * itemsize        # x tile (double buffered)
                + 2 * tm * d_model_p * itemsize      # out tile (double buffered)
                + 2 * d_model_p * th * itemsize      # W1 chunk (double buffered)
                + 2 * th * d_model_p * itemsize      # W2 chunk (double buffered)
                + tm * d_model_p * 4                 # f32 accumulator scratch
                + 4 * (th + d_model_p) * itemsize)   # bias chunks
    # Explicit scoped-VMEM limit: scale with tiles, clamp so it fits v5e/v7x comfortably.
    vmem_limit = min(max(int(1.5 * resident) + (4 << 20), 16 << 20), 48 << 20)

    cost = pl.CostEstimate(
        flops=2 * 2 * n * d_model * hidden,              # two matmuls
        transcendentals=n * hidden,                       # erf per hidden activation
        bytes_accessed=(x.size + w1.size + b1.size + w2.size + b2.size
                        + n * d_model) * itemsize)

    out_p = pl.pallas_call(
        _ffn_kernel,
        out_shape=jax.ShapeDtypeStruct((n_p, d_model_p), x.dtype),
        grid_spec=pltpu.PrefetchScalarGridSpec(
            num_scalar_prefetch=0,
            grid=grid,
            in_specs=[
                pl.BlockSpec((tm, d_model_p), lambda i, k: (i, 0)),   # x row tile (resident over k)
                pl.BlockSpec((d_model_p, th), lambda i, k: (0, k)),   # W1 hidden chunk
                pl.BlockSpec((1, th), lambda i, k: (0, k)),           # b1 hidden chunk
                pl.BlockSpec((th, d_model_p), lambda i, k: (k, 0)),   # W2 hidden chunk
                pl.BlockSpec((1, d_model_p), lambda i, k: (0, 0)),    # b2 (finalize only)
            ],
            out_specs=pl.BlockSpec((tm, d_model_p), lambda i, k: (i, 0)),
            scratch_shapes=[pltpu.VMEM((tm, d_model_p), jnp.float32)],
        ),
        compiler_params=pltpu.CompilerParams(
            dimension_semantics=("parallel", "arbitrary"),
            vmem_limit_bytes=vmem_limit),
        cost_estimate=cost,
    )(x_p, w1_p, b1_p, w2_p, b2_p)

    return out_p[:n, :d_model]


def _reference(x, w1, b1, w2, b2):
    h = x @ w1 + b1
    h = 0.5 * h * (1.0 + jax.lax.erf(h / jnp.sqrt(2.0)))
    return h @ w2 + b2


if __name__ == "__main__":
    # Small shapes implied by SummeRBlock's channel_mixer (FeedForward): tokens x d_model input.
    batch, seq, d_model, hidden = 2, 8, 32, 64

    key = jax.random.PRNGKey(0)
    kx, kw1, kb1, kw2, kb2 = jax.random.split(key, 5)

    x = jax.random.normal(kx, (batch * seq, d_model), dtype=jnp.float32)
    # Deterministic parameter init (synthetic, not a checkpoint load).
    w1 = jax.random.normal(kw1, (d_model, hidden), dtype=jnp.float32) * 0.05
    b1 = jax.random.normal(kb1, (hidden,), dtype=jnp.float32) * 0.01
    w2 = jax.random.normal(kw2, (hidden, d_model), dtype=jnp.float32) * 0.05
    b2 = jax.random.normal(kb2, (d_model,), dtype=jnp.float32) * 0.01

    out = jax.block_until_ready(feed_forward(x, w1, b1, w2, b2))
    ref = _reference(x, w1, b1, w2, b2)
    assert out.shape == (batch * seq, d_model)
    assert jnp.allclose(out, ref, atol=1e-5, rtol=1e-5), "mismatch vs reference (small shape)"

    # Second config exercising the real tiling path: 2 row tiles x 2 hidden chunks, with the
    # accumulator init/finalize and the single b2 add at the end.
    n2, d2, h2 = 512, 128, 512
    k2 = jax.random.split(jax.random.PRNGKey(1), 5)
    x2 = jax.random.normal(k2[0], (n2, d2), dtype=jnp.float32)
    w1b = jax.random.normal(k2[1], (d2, h2), dtype=jnp.float32) * 0.03
    b1b = jax.random.normal(k2[2], (h2,), dtype=jnp.float32) * 0.1
    w2b = jax.random.normal(k2[3], (h2, d2), dtype=jnp.float32) * 0.03
    b2b = jax.random.normal(k2[4], (d2,), dtype=jnp.float32) * 0.1
    out2 = jax.block_until_ready(
        feed_forward(x2, w1b, b1b, w2b, b2b, tile_m=256, tile_h=256))
    ref2 = _reference(x2, w1b, b1b, w2b, b2b)
    assert out2.shape == (n2, d2)
    assert jnp.allclose(out2, ref2, atol=3e-3, rtol=3e-3), "mismatch vs reference (tiled shape)"

    print("KERNEL_OK")
</pallas_src>

<mosaic_0001>
module attributes {stable_mosaic.version = 11 : i64} {
  func.func @_ffn_kernel(%arg0: i32, %arg1: i32, %arg2: memref<16x128xf32, #tpu.memory_space<vmem>>, %arg3: memref<128x128xf32, #tpu.memory_space<vmem>>, %arg4: memref<1x128xf32, #tpu.memory_space<vmem>>, %arg5: memref<128x128xf32, #tpu.memory_space<vmem>>, %arg6: memref<1x128xf32, #tpu.memory_space<vmem>>, %arg7: memref<16x128xf32, #tpu.memory_space<vmem>>, %arg8: memref<16x128xf32, #tpu.memory_space<vmem>>) attributes {dimension_semantics = [#tpu.dimension_semantics<parallel>, #tpu.dimension_semantics<arbitrary>], iteration_bounds = array<i64: 1, 1>, scalar_prefetch = 0 : i64, scratch_operands = 1 : i64, tpu.core_type = #tpu.core_type<tc>, window_params = [{transform_indices = @transform_0, window_bounds = array<i64: 16, 128>}, {transform_indices = @transform_1, window_bounds = array<i64: 128, 128>}, {transform_indices = @transform_2, window_bounds = array<i64: 1, 128>}, {transform_indices = @transform_3, window_bounds = array<i64: 128, 128>}, {pipeline_mode = #tpu.pipeline_mode<synchronous>, transform_indices = @transform_4, window_bounds = array<i64: 1, 128>}, {transform_indices = @transform_5, window_bounds = array<i64: 16, 128>}]} {
    %c0_i32 = arith.constant 0 : i32
    %0 = arith.cmpi eq, %arg1, %c0_i32 : i32
    %1 = arith.extui %0 : i1 to i32
    %c0_i32_0 = arith.constant 0 : i32
    %2 = arith.cmpi ne, %1, %c0_i32_0 : i32
    scf.if %2 {
      %cst_18 = arith.constant 0.000000e+00 : f32
      %25 = vector.broadcast %cst_18 : f32 to vector<16x128xf32>
      %c0_19 = arith.constant 0 : index
      %c0_20 = arith.constant 0 : index
      %26 = vector.load %arg8[%c0_19, %c0_20] : memref<16x128xf32, #tpu.memory_space<vmem>>, vector<16x128xf32>
      tpu.vector_store %arg8[%c0_19, %c0_20], %25 {strides = array<i32>} : memref<16x128xf32, #tpu.memory_space<vmem>>, vector<16x128xf32>,
    } else {
    }
    %c0 = arith.constant 0 : index
    %c0_1 = arith.constant 0 : index
    %3 = vector.load %arg2[%c0, %c0_1] : memref<16x128xf32, #tpu.memory_space<vmem>>, vector<16x128xf32>
    %c0_2 = arith.constant 0 : index
    %c0_3 = arith.constant 0 : index
    %4 = vector.load %arg3[%c0_2, %c0_3] : memref<128x128xf32, #tpu.memory_space<vmem>>, vector<128x128xf32>
    %cst = arith.constant dense<0.000000e+00> : vector<16x128xf32>
    %5 = tpu.matmul %3, %4, %cst {dimension_numbers = #tpu.dot_dimension_numbers<[1], [0], [0], [1], [0, 0, 1, 1], [], []>} : vector<16x128xf32>, vector<128x128xf32>, vector<16x128xf32> -> vector<16x128xf32>
    %c0_4 = arith.constant 0 : index
    %c0_5 = arith.constant 0 : index
    %6 = vector.load %arg4[%c0_4, %c0_5] : memref<1x128xf32, #tpu.memory_space<vmem>>, vector<1x128xf32>
    %7 = vector.broadcast %6 : vector<1x128xf32> to vector<16x128xf32>
    %8 = arith.addf %5, %7 : vector<16x128xf32>
    %cst_6 = arith.constant 5.000000e-01 : f32
    %9 = vector.broadcast %cst_6 : f32 to vector<16x128xf32>
    %10 = arith.mulf %9, %8 : vector<16x128xf32>
    %cst_7 = arith.constant 0.707106769 : f32
    %11 = vector.broadcast %cst_7 : f32 to vector<16x128xf32>
    %12 = arith.mulf %8, %11 : vector<16x128xf32>
    %13 = math.erf %12 : vector<16x128xf32>
    %cst_8 = arith.constant 1.000000e+00 : f32
    %14 = vector.broadcast %cst_8 : f32 to vector<16x128xf32>
    %15 = arith.addf %14, %13 : vector<16x128xf32>
    %16 = arith.mulf %10, %15 : vector<16x128xf32>
    %c0_9 = arith.constant 0 : index
    %c0_10 = arith.constant 0 : index
    %17 = vector.load %arg8[%c0_9, %c0_10] : memref<16x128xf32, #tpu.memory_space<vmem>>, vector<16x128xf32>
    %c0_11 = arith.constant 0 : index
    %c0_12 = arith.constant 0 : index
    %18 = vector.load %arg5[%c0_11, %c0_12] : memref<128x128xf32, #tpu.memory_space<vmem>>, vector<128x128xf32>
    %cst_13 = arith.constant dense<0.000000e+00> : vector<16x128xf32>
    %19 = tpu.matmul %16, %18, %cst_13 {dimension_numbers = #tpu.dot_dimension_numbers<[1], [0], [0], [1], [0, 0, 1, 1], [], []>} : vector<16x128xf32>, vector<128x128xf32>, vector<16x128xf32> -> vector<16x128xf32>
    %20 = arith.addf %17, %19 : vector<16x128xf32>
    %c0_14 = arith.constant 0 : index
    %c0_15 = arith.constant 0 : index
    %21 = vector.load %arg8[%c0_14, %c0_15] : memref<16x128xf32, #tpu.memory_space<vmem>>, vector<16x128xf32>
    tpu.vector_store %arg8[%c0_14, %c0_15], %20 {strides = array<i32>} : memref<16x128xf32, #tpu.memory_space<vmem>>, vector<16x128xf32>,
    %c0_i32_16 = arith.constant 0 : i32
    %22 = arith.cmpi eq, %arg1, %c0_i32_16 : i32
    %23 = arith.extui %22 : i1 to i32
    %c0_i32_17 = arith.constant 0 : i32
    %24 = arith.cmpi ne, %23, %c0_i32_17 : i32
    scf.if %24 {
      %c0_18 = arith.constant 0 : index
      %c0_19 = arith.constant 0 : index
      %25 = vector.load %arg8[%c0_18, %c0_19] : memref<16x128xf32, #tpu.memory_space<vmem>>, vector<16x128xf32>
      %c0_20 = arith.constant 0 : index
      %c0_21 = arith.constant 0 : index
      %26 = vector.load %arg6[%c0_20, %c0_21] : memref<1x128xf32, #tpu.memory_space<vmem>>, vector<1x128xf32>
      %27 = vector.broadcast %26 : vector<1x128xf32> to vector<16x128xf32>
      %28 = arith.addf %25, %27 : vector<16x128xf32>
      %c0_22 = arith.constant 0 : index
      %c0_23 = arith.constant 0 : index
      %29 = vector.load %arg7[%c0_22, %c0_23] : memref<16x128xf32, #tpu.memory_space<vmem>>, vector<16x128xf32>
      tpu.vector_store %arg7[%c0_22, %c0_23], %28 {strides = array<i32>} : memref<16x128xf32, #tpu.memory_space<vmem>>, vector<16x128xf32>,
    } else {
    }
    return
  }
  func.func @transform_0(%arg0: i32, %arg1: i32) -> (i32, i32) {
    %c0_i32 = arith.constant 0 : i32
    %c0_i32_0 = arith.constant 0 : i32
    return %arg0, %c0_i32 : i32, i32
  }
  func.func @transform_1(%arg0: i32, %arg1: i32) -> (i32, i32) {
    %c0_i32 = arith.constant 0 : i32
    %c0_i32_0 = arith.constant 0 : i32
    return %c0_i32, %arg1 : i32, i32
  }
  func.func @transform_2(%arg0: i32, %arg1: i32) -> (i32, i32) {
    %c0_i32 = arith.constant 0 : i32
    %c0_i32_0 = arith.constant 0 : i32
    return %c0_i32, %arg1 : i32, i32
  }
  func.func @transform_3(%arg0: i32, %arg1: i32) -> (i32, i32) {
    %c0_i32 = arith.constant 0 : i32
    %c0_i32_0 = arith.constant 0 : i32
    return %arg1, %c0_i32 : i32, i32
  }
  func.func @transform_4(%arg0: i32, %arg1: i32) -> (i32, i32) {
    %c0_i32 = arith.constant 0 : i32
    %c0_i32_0 = arith.constant 0 : i32
    %c0_i32_1 = arith.constant 0 : i32
    return %c0_i32, %c0_i32_0 : i32, i32
  }
  func.func @transform_5(%arg0: i32, %arg1: i32) -> (i32, i32) {
    %c0_i32 = arith.constant 0 : i32
    %c0_i32_0 = arith.constant 0 : i32
    return %arg0, %c0_i32 : i32, i32
  }
}

</mosaic_0001>

<bundles_post_ra>
// kernel: feed_forward.1
= control target key start
LH: loop header
LB: loop body
LE: loop exit
PB: predicated region body
PF: predicated region fallthrough
CT: control target
= control target key end

     0   :  { %s479_s0 = inlined_call_operand.vmem [shape: f32[16,128], index: 0, kind: input, shape index: {}]   ;;  %s480_s1 = inlined_call_operand.vmem [shape: f32[128,128], index: 1, kind: input, shape index: {}]   ;;  %s481_s2 = inlined_call_operand.vmem [shape: f32[1,128], index: 2, kind: input, shape index: {}]   ;;  %s482_s3 = inlined_call_operand.vmem [shape: f32[128,128], index: 3, kind: input, shape index: {}]   ;;  %s483_s4 = inlined_call_operand.vmem [shape: f32[1,128], index: 4, kind: input, shape index: {}]   ;;  %s484_s5 = inlined_call_operand.hbm [shape: f32[16,128], index: 5, kind: output, shape index: {}]  }
   0x1   :  { %v44_v0 = vld [vmem:[%s480_s1 + $0x78] sm:$0xff]  ;;  %v43_v1 = vld [vmem:[%s480_s1 + $0x70] sm:$0xff]  ;;  %v42_v2 = vld [vmem:[%s480_s1 + $0x68] sm:$0xff] }
   0x2   :  { %49 = vmatpush.msra.mxu0 %v44_v0  ;;  %238 = vmatpush.msra.mxu2 %v44_v0  ;;  %v41_v3 = vld [vmem:[%s480_s1 + $0x60] sm:$0xff]  ;;  %v40_v4 = vld [vmem:[%s480_s1 + $0x58] sm:$0xff] }
   0x4   :  { %50 = vmatpush.msra.mxu0 %v43_v1  ;;  %239 = vmatpush.msra.mxu2 %v43_v1 }
   0x6   :  { %51 = vmatpush.msra.mxu0 %v42_v2  ;;  %240 = vmatpush.msra.mxu2 %v42_v2 }
   0x8   :  { %52 = vmatpush.msra.mxu0 %v41_v3  ;;  %241 = vmatpush.msra.mxu2 %v41_v3 }
   0x9   :  { %10 = vsyncpa [#allocation4], 0  ;;  %v39_v5 = vld [vmem:[%s480_s1 + $0x50] sm:$0xff]  ;;  %v38_v6 = vld [vmem:[%s480_s1 + $0x48] sm:$0xff]  ;;  %s305_s9 = smov [#allocation3]   ;;  %s224_s13 = sshll.u32 %s484_s5, 4  ;;  %s225_s13 = int_to_ptr.hbm [resolvable:$true] %s224_s13 }
   0xa   :  { %53 = vmatpush.msra.mxu0 %v40_v4  ;;  %242 = vmatpush.msra.mxu2 %v40_v4  ;;  %v37_v7 = vld [vmem:[%s480_s1 + $0x40] sm:$0xff]  ;;  %v36_v8 = vld [vmem:[%s480_s1 + $0x38] sm:$0xff]  ;;  %v35_v9 = vld [vmem:[%s480_s1 + $0x30] sm:$0xff]  ;;  %s222_s10 = sshll.u32 %s305_s9, 4  ;;  %s306_s14 = smov 128   ;;  %s223_s10 = int_to_ptr.vmem [resolvable:$true] %s222_s10 }
   0xb   :  { %v34_v10 = vld [vmem:[%s480_s1 + $0x28] sm:$0xff]  ;;  %v33_v11 = vld [vmem:[%s480_s1 + $0x20] sm:$0xff]  ;;  %v32_v12 = vld [vmem:[%s480_s1 + $0x18] sm:$0xff]  ;;  %s307_s15 = smov 8  }
   0xc   :  { %54 = vmatpush.msra.mxu0 %v39_v5  ;;  %243 = vmatpush.msra.mxu2 %v39_v5  ;;  %v31_v13 = vld [vmem:[%s480_s1 + $0x10] sm:$0xff]  ;;  %v30_v14 = vld [vmem:[%s480_s1 + $0x8] sm:$0xff]  ;;  %v29_v15 = vld [vmem:[%s480_s1] sm:$0xff] }
   0xd   :  { %v27_v16 = vld [vmem:[%s479_s0] sm:$0xff]  ;;  %v28_v17 = vld [vmem:[%s479_s0 + $0x8] sm:$0xff]  ;;  %v177_v18 = vld [vmem:[%s482_s3 + $0x78] sm:$0xff] }
   0xe   :  { %55 = vmatpush.msra.mxu0 %v38_v6  ;;  %244 = vmatpush.msra.mxu2 %v38_v6  ;;  %v176_v19 = vld [vmem:[%s482_s3 + $0x70] sm:$0xff]  ;;  %v175_v20 = vld [vmem:[%s482_s3 + $0x68] sm:$0xff]  ;;  %v174_v21 = vld [vmem:[%s482_s3 + $0x60] sm:$0xff] }
   0xf   :  { %178 = vmatpush.msra.mxu1 %v177_v18  ;;  %254 = vmatpush.msra.mxu3 %v177_v18  ;;  %v273_v22 = vld [vmem:[%s481_s2] ss:$0 sm:$0xff]  ;;  %v173_v23 = vld [vmem:[%s482_s3 + $0x58] sm:$0xff]  ;;  %v172_v25 = vld [vmem:[%s482_s3 + $0x50] sm:$0xff] }
  0x10   :  { %56 = vmatpush.msra.mxu0 %v37_v7  ;;  %245 = vmatpush.msra.mxu2 %v37_v7  ;;  %v171_v27 = vld [vmem:[%s482_s3 + $0x48] sm:$0xff]  ;;  %v170_v29 = vld [vmem:[%s482_s3 + $0x40] sm:$0xff]  ;;  %v169_v30 = vld [vmem:[%s482_s3 + $0x38] sm:$0xff] }
  0x11   :  { %179 = vmatpush.msra.mxu1 %v176_v19  ;;  %255 = vmatpush.msra.mxu3 %v176_v19  ;;  %v168_v33 = vld [vmem:[%s482_s3 + $0x30] sm:$0xff]  ;;  %v167_v36 = vld [vmem:[%s482_s3 + $0x28] sm:$0xff]  ;;  %v166_v39 = vld [vmem:[%s482_s3 + $0x20] sm:$0xff] }
  0x12   :  { %57 = vmatpush.msra.mxu0 %v36_v8  ;;  %246 = vmatpush.msra.mxu2 %v36_v8  ;;  %v165_v43 = vld [vmem:[%s482_s3 + $0x18] sm:$0xff]  ;;  %v164_v47 = vld [vmem:[%s482_s3 + $0x10] sm:$0xff]  ;;  %v163_v52 = vld [vmem:[%s482_s3 + $0x8] sm:$0xff] }
  0x13   :  { %180 = vmatpush.msra.mxu1 %v175_v20  ;;  %256 = vmatpush.msra.mxu3 %v175_v20  ;;  %v162_v56 = vld [vmem:[%s482_s3] sm:$0xff] }
  0x14   :  { %58 = vmatpush.msra.mxu0 %v35_v9  ;;  %247 = vmatpush.msra.mxu2 %v35_v9 }
  0x15   :  { %181 = vmatpush.msra.mxu1 %v174_v21  ;;  %257 = vmatpush.msra.mxu3 %v174_v21 }
  0x16   :  { %59 = vmatpush.msra.mxu0 %v34_v10  ;;  %248 = vmatpush.msra.mxu2 %v34_v10 }
  0x17   :  { %182 = vmatpush.msra.mxu1 %v173_v23  ;;  %258 = vmatpush.msra.mxu3 %v173_v23 }
  0x18   :  { %60 = vmatpush.msra.mxu0 %v33_v11  ;;  %249 = vmatpush.msra.mxu2 %v33_v11 }
  0x19   :  { %183 = vmatpush.msra.mxu1 %v172_v25  ;;  %259 = vmatpush.msra.mxu3 %v172_v25 }
  0x1a   :  { %61 = vmatpush.msra.mxu0 %v32_v12  ;;  %250 = vmatpush.msra.mxu2 %v32_v12 }
  0x1b   :  { %184 = vmatpush.msra.mxu1 %v171_v27  ;;  %260 = vmatpush.msra.mxu3 %v171_v27 }
  0x1c   :  { %62 = vmatpush.msra.mxu0 %v31_v13  ;;  %251 = vmatpush.msra.mxu2 %v31_v13 }
  0x1d   :  { %185 = vmatpush.msra.mxu1 %v170_v29  ;;  %261 = vmatpush.msra.mxu3 %v170_v29 }
  0x1e   :  { %63 = vmatpush.msra.mxu0 %v30_v14  ;;  %252 = vmatpush.msra.mxu2 %v30_v14 }
  0x1f   :  { %186 = vmatpush.msra.mxu1 %v169_v30  ;;  %262 = vmatpush.msra.mxu3 %v169_v30 }
  0x20   :  { %64 = vmatpush.msra.mxu0 %v29_v15  ;;  %253 = vmatpush.msra.mxu2 %v29_v15 }
  0x21   :  { %65 = vmatmul.f32.vlgmr.msra.gmra.mxu0 %v27_v16  ;;  %68 = vmatmul.f32.vlgmr.msra.gmra.mxu2 %v28_v17 }
  0x22   :  { %187 = vmatpush.msra.mxu1 %v168_v33  ;;  %263 = vmatpush.msra.mxu3 %v168_v33 }
  0x24   :  { %188 = vmatpush.msra.mxu1 %v167_v36  ;;  %264 = vmatpush.msra.mxu3 %v167_v36 }
  0x26   :  { %189 = vmatpush.msra.mxu1 %v166_v39  ;;  %265 = vmatpush.msra.mxu3 %v166_v39 }
  0x28   :  { %190 = vmatpush.msra.mxu1 %v165_v43  ;;  %266 = vmatpush.msra.mxu3 %v165_v43 }
  0x2a   :  { %191 = vmatpush.msra.mxu1 %v164_v47  ;;  %267 = vmatpush.msra.mxu3 %v164_v47 }
  0x2c   :  { %192 = vmatpush.msra.mxu1 %v163_v52  ;;  %268 = vmatpush.msra.mxu3 %v163_v52 }
  0x2e   :  { %193 = vmatpush.msra.mxu1 %v162_v56  ;;  %269 = vmatpush.msra.mxu3 %v162_v56  ;;  %v274_v56 = vld [vmem:[%s483_s4] ss:$0 sm:$0xff] }
  0x9e   :  { %v66_v24 = vpop.f32.mrf.mxu0 }
  0x9f   :  { %v413_v26 = vadd.f32 %v273_v22, %v66_v24 }
  0xa1   :  { %v419_v28 = vmul.f32 0.70710677, %v413_v26  ;;  %v72_v47 = vmul.f32 0.5, %v413_v26 }
  0xa3   :  { %v76_v31 = vmul.f32 %v419_v28, %v419_v28 }
  0xa4   :  { %v69_v32 = vpop.f32.mrf.mxu2 }
  0xa5   :  { %v432_v34 = vmin.f32 %v76_v31, 16.0  ;;  %v434_v35 = vadd.f32 %v273_v22, %v69_v32 }
  0xa7   :  { %v78_v37 = vmul.f32 2.1237322e-06, %v432_v34  ;;  %v441_v38 = vmul.f32 0.70710677, %v434_v35  ;;  %v89_v40 = vmul.f32 3.8918573e-05, %v432_v34 }
  0xa9   :  { %v79_v41 = vadd.f32 0.00028619796, %v78_v37  ;;  %v116_v42 = vmul.f32 %v441_v38, %v441_v38  ;;  %v90_v44 = vadd.f32 0.001143296, %v89_v40 }
  0xab   :  { %v80_v45 = vmul.f32 %v79_v41, %v432_v34  ;;  %v117_v46 = vmin.f32 %v116_v42, 16.0  ;;  %v91_v48 = vmul.f32 %v90_v44, %v432_v34 }
  0xad   :  { %v118_v49 = vmul.f32 2.1237322e-06, %v117_v46  ;;  %v129_v50 = vmul.f32 3.8918573e-05, %v117_v46  ;;  %v81_v51 = vadd.f32 0.0036580483, %v80_v45 }
  0xae   :  { %v92_v53 = vadd.f32 0.014752088, %v91_v48 }
  0xaf   :  { %v119_v54 = vadd.f32 0.00028619796, %v118_v49  ;;  %v130_v55 = vadd.f32 0.001143296, %v129_v50  ;;  %v82_v60 = vmul.f32 %v81_v51, %v432_v34 }
  0xb0   :  { %v93_v57 = vmul.f32 %v92_v53, %v432_v34  ;;  %v73_v53 = vmul.f32 0.5, %v434_v35 }
  0xb1   :  { %v120_v58 = vmul.f32 %v119_v54, %v117_v46  ;;  %v131_v59 = vmul.f32 %v130_v55, %v117_v46  ;;  %v83_v2 = vadd.f32 0.05243302, %v82_v60 }
  0xb2   :  { %v94_v61 = vadd.f32 0.112945676, %v93_v57 }
  0xb3   :  { %v121_v62 = vadd.f32 0.0036580483, %v120_v58  ;;  %v132_v63 = vadd.f32 0.014752088, %v131_v59  ;;  %v84_v8 = vmul.f32 %v83_v2, %v432_v34 }
  0xb4   :  { %v95_v0 = vmul.f32 %v94_v61, %v432_v34 }
  0xb5   :  { %v133_v1 = vmul.f32 %v132_v63, %v117_v46  ;;  %v122_v4 = vmul.f32 %v121_v62, %v117_v46  ;;  %v85_v13 = vadd.f32 0.18741608, %v84_v8 }
  0xb6   :  { %v96_v3 = vadd.f32 0.4994258, %v95_v0 }
  0xb7   :  { %v134_v5 = vadd.f32 0.112945676, %v133_v1  ;;  %v123_v10 = vadd.f32 0.05243302, %v122_v4  ;;  %v86_v17 = vmul.f32 %v85_v13, %v432_v34 }
  0xb8   :  { %v97_v6 = vmul.f32 %v96_v3, %v432_v34 }
  0xb9   :  { %v135_v7 = vmul.f32 %v134_v5, %v117_v46  ;;  %v124_v14 = vmul.f32 %v123_v10, %v117_v46  ;;  %v87_v21 = vadd.f32 1.1283791, %v86_v17 }
  0xba   :  { %v98_v9 = vadd.f32 1.0, %v97_v6 }
  0xbb   :  { %v136_v11 = vadd.f32 0.4994258, %v135_v7  ;;  %v125_v18 = vadd.f32 0.18741608, %v124_v14  ;;  %v88_v31 = vmul.f32 %v87_v21, %v419_v28 }
  0xbc   :  { %275 = vrcp.f32 %v98_v9  ;;  %v110_v22 = vand.u32 2147483648, %v98_v9  ;;  %v108_v27 = vand.u32 2147483647, %v98_v9  ;;  %vm104_vm1 = vweird.f32 %v98_v9 }
  0xbd   :  { %v137_v12 = vmul.f32 %v136_v11, %v117_v46  ;;  %v126_v24 = vmul.f32 %v125_v18, %v117_v46 }
  0xbe   :  { %v111_v32 = vor.u32 1.1754944e-38, %v110_v22  ;;  %vm109_vm3 = vcmp.eq.f32.partialorder %v108_v27, 8.507059e+37 }
  0xbf   :  { %v138_v15 = vadd.f32 1.0, %v137_v12  ;;  %v127_v36 = vadd.f32 1.1283791, %v126_v24 }
  0xc1   :  { %277 = vrcp.f32 %v138_v15  ;;  %v150_v37 = vand.u32 2147483648, %v138_v15  ;;  %v148_v41 = vand.u32 2147483647, %v138_v15  ;;  %vm144_vm5 = vweird.f32 %v138_v15 }
  0xc2   :  { %v276_v16 = vpop.eup %275  ;;  %v128_v46 = vmul.f32 %v127_v36, %v441_v38 }
  0xc3   :  { %v100_v19 = vmul.f32 %v276_v16, %v98_v9  ;;  %vm105_vm0 = vweird.f32 %v276_v16  ;;  %v151_v45 = vor.u32 1.1754944e-38, %v150_v37  ;;  %vm149_vm7 = vcmp.eq.f32.partialorder %v148_v41, 8.507059e+37 }
  0xc4   :  { %vm106_vm2 = vmor %vm104_vm1, %vm105_vm0 }
  0xc5   :  { %v101_v20 = vsub.f32 1.0, %v100_v19 }
  0xc7   :  { %v278_v23 = vpop.eup %277  ;;  %v102_v25 = vmul.f32 %v276_v16, %v101_v20 }
  0xc8   :  { %v140_v29 = vmul.f32 %v278_v23, %v138_v15  ;;  %vm145_vm4 = vweird.f32 %v278_v23 }
  0xc9   :  { %v103_v30 = vadd.f32 %v276_v16, %v102_v25  ;;  %vm146_vm6 = vmor %vm144_vm5, %vm145_vm4 }
  0xca   :  { %v141_v33 = vsub.f32 1.0, %v140_v29 }
  0xcb   :  { %v107_v34 = vsel %vm106_vm2, %v276_v16, %v103_v30 }
  0xcc   :  { %v112_v39 = vsel %vm109_vm3, %v111_v32, %v107_v34  ;;  %v142_v40 = vmul.f32 %v278_v23, %v141_v33 }
  0xcd   :  { %v113_v42 = vmul.f32 %v112_v39, %v88_v31 }
  0xce   :  { %v143_v43 = vadd.f32 %v278_v23, %v142_v40 }
  0xcf   :  { %v236_v44 = vclamps-f32 %v113_v42, 1.0 }
  0xd0   :  { %v147_v28 = vsel %vm146_vm6, %v278_v23, %v143_v43 }
  0xd1   :  { %v156_v48 = vadd.f32 1.0, %v236_v44  ;;  %v152_v49 = vsel %vm149_vm7, %v151_v45, %v147_v28 }
  0xd2   :  { %v153_v50 = vmul.f32 %v152_v49, %v128_v46 }
  0xd3   :  { %v158_v51 = vmul.f32 %v156_v48, %v72_v47 }
  0xd4   :  { %v237_v52 = vclamps-f32 %v153_v50, 1.0 }
  0xd5   :  { %194 = vmatmul.f32.vlgmr.msra.gmra.mxu1 %v158_v51 }
  0xd6   :  { %v157_v54 = vadd.f32 1.0, %v237_v52 }
  0xd8   :  { %v159_v55 = vmul.f32 %v157_v54, %v73_v53 }
  0xda   :  { %197 = vmatmul.f32.vlgmr.msra.gmra.mxu3 %v159_v55 }
 0x152   :  { %v195_v38 = vpop.f32.mrf.mxu1 }
 0x153   :  { %v214_v57 = vadd.f32 %v274_v56, %v195_v38 }
 0x155   :  { %216 = vst [vmem:[#allocation3] sm:$0xff] %v214_v57 }
 0x15d   :  { %v198_v26 = vpop.f32.mrf.mxu3 }
 0x15e   :  { %v215_v35 = vadd.f32 %v274_v56, %v198_v26 }
 0x160   :  { %217 = vst [vmem:[#allocation3 + $0x8] sm:$0xff] %v215_v35 }
 0x161   :  { %230 = dma.vmem_to_hbm [thread:$0]  %s223_s10, 256, %s225_s13, [#allocation4], %s306_s14, %s306_s14, %s307_s15  }
 0x162   :  { %303 = dma.done.wait [#allocation4], 256  }
 0x163   :  { %304 = vsyncadd [#allocation4], 4294967040 }
 0x164   :  { %235 = vsyncpa [#allocation4], 1 }

</bundles_post_ra>
